<compile_context>
chip_gen: v7x
topology: tpu7x:2x2x1
jax: 0.10.0
libtpu: 0.0.40
codegen_flags: <defaults>
</compile_context>

<pallas_src>
import jax
import jax.numpy as jnp
from jax.experimental import pallas as pl
from jax.experimental.pallas import tpu as pltpu


_VMEM_LIMIT_BYTES = 32 << 20   # scoped VMEM requested from Mosaic (safe on v5e/v6e/v7x)
_BLOCK_TARGET_BYTES = 4 << 20  # target bytes for one x/out block (~85%+ of HBM roofline)


def add_pos_kernel(x_ref, pos_ref, o_ref):
    # Lane-dense elementwise add; the (1, lt) pos block broadcasts over the
    # bt batch rows of the x block.
    o_ref[...] = x_ref[...] + pos_ref[...]


def _round_down(v, m):
    return max(m, (v // m) * m)


def _choose_tiles(B, L, itemsize):
    """Pick (bt, lt) such that:
       * blocks respect the (8, 128) second-minor/minor rule (multiple of
         8 / 128, or the full extent),
       * one x block is ~_BLOCK_TARGET_BYTES, so the live VMEM
         (2*x + 2*out + 2*pos blocks) stays well inside _VMEM_LIMIT_BYTES,
       * non-trivial problems never end up with a 1-step grid (v7x has two
         TensorCores and can only shard grid steps).
    """
    row_bytes = L * itemsize
    if B * row_bytes <= _BLOCK_TARGET_BYTES:
        # Whole array fits in one target-sized block.
        bt, lt = B, L
    elif 8 * row_bytes <= _BLOCK_TARGET_BYTES and B >= 8:
        # Tile along batch only; full lane width keeps stores unmasked.
        bt = min(_round_down(_BLOCK_TARGET_BYTES // row_bytes, 8),
                 _round_down(B, 8))
        lt = L
    else:
        # Even a few rows exceed the budget -> tile along the lane axis too.
        bt = B if B < 8 else 8
        lanes = max(128, _BLOCK_TARGET_BYTES // (bt * itemsize))
        lt = min(_round_down(lanes, 128), L)

    # v7x megacore: avoid a single-step grid on non-trivial problems so both
    # TensorCores stream their own HBM traffic.
    total_bytes = B * L * itemsize
    if pl.cdiv(B, bt) * pl.cdiv(L, lt) < 2 and total_bytes >= (2 << 20):
        if bt >= 16:
            bt = _round_down(bt // 2, 8)
        elif lt >= 256:
            lt = _round_down(lt // 2, 128)
    return bt, lt


def positional_encoding(x, pos_embedding, *, donate_x=False):
    """out = x + pos_embedding.  x: (B, S, D), pos_embedding: (1, S, D)."""
    B, S, D = x.shape
    assert pos_embedding.shape == (1, S, D), pos_embedding.shape

    # Match PyTorch type promotion: x + pos computes in the promoted dtype
    # (e.g. bf16 x + fp32 pos -> fp32), instead of downcasting pos.
    out_dtype = jnp.result_type(x.dtype, pos_embedding.dtype)
    L = S * D
    itemsize = jnp.dtype(out_dtype).itemsize

    # Lane-dense 2D views: the kernel's last dim is S*D, so stores are
    # full-width whenever S*D is a multiple of 128 (true for the shapes here
    # and typical ViT dims). The casts are no-ops when dtypes already match;
    # callers should pre-cast pos at parameter-prep time for the hot path.
    x2 = x.reshape(B, L).astype(out_dtype)
    pos2 = pos_embedding.reshape(1, L).astype(out_dtype)

    bt, lt = _choose_tiles(B, L, itemsize)
    nj, ni = pl.cdiv(L, lt), pl.cdiv(B, bt)

    cost = pl.CostEstimate(
        flops=B * L,
        transcendentals=0,
        bytes_accessed=(2 * B * L + L) * itemsize,
    )

    out2 = pl.pallas_call(
        add_pos_kernel,
        out_shape=jax.ShapeDtypeStruct((B, L), out_dtype),
        # L axis (j) is the OUTER grid axis: the pos block index (0, j) stays
        # constant across the inner batch sweep, so pos is fetched only nj
        # times total (not once per grid step).
        grid=(nj, ni),
        in_specs=[
            pl.BlockSpec((bt, lt), lambda j, i: (i, j)),   # x
            pl.BlockSpec((1, lt), lambda j, i: (0, j)),    # pos (broadcast over batch)
        ],
        out_specs=pl.BlockSpec((bt, lt), lambda j, i: (i, j)),
        input_output_aliases={0: 0} if donate_x else {},
        compiler_params=pltpu.CompilerParams(
            # Pure elementwise -> every grid step is independent; lets v7x
            # shard steps across both TensorCores.
            dimension_semantics=("parallel", "parallel"),
            # Explicit scoped-VMEM limit: 2x(x)+2x(out)+2x(pos) live blocks
            # (~16-17 MiB at the 4 MiB block target) must fit on every
            # generation (v5e's default scoped limit is only 16 MiB).
            vmem_limit_bytes=_VMEM_LIMIT_BYTES,
        ),
        cost_estimate=cost,
    )(x2, pos2)

    return out2.reshape(B, S, D)


if __name__ == "__main__":
    # Module config: num_patches=7 -> seq = num_patches + 1 = 8, embed_dim=32, batch=2
    num_patches = 7
    embed_dim = 32
    batch = 2
    seq = num_patches + 1

    key = jax.random.PRNGKey(0)
    k_x, k_pos = jax.random.split(key)

    x = jax.random.normal(k_x, (batch, seq, embed_dim), dtype=jnp.float32)
    # Deterministic stand-in for torch.randn(1, num_patches + 1, embed_dim)
    pos_embedding = jax.random.normal(k_pos, (1, seq, embed_dim), dtype=jnp.float32)

    out = positional_encoding(x, pos_embedding)
    out = jax.block_until_ready(out)

    # Correctness check against plain JAX broadcast add
    expected = x + pos_embedding
    assert out.shape == (batch, seq, embed_dim)
    assert jnp.allclose(out, expected, atol=1e-6), "mismatch vs reference"

    print("KERNEL_OK")
</pallas_src>

<mosaic_0001>
module attributes {stable_mosaic.version = 11 : i64} {
  func.func @add_pos_kernel(%arg0: i32, %arg1: i32, %arg2: memref<2x256xf32, #tpu.memory_space<vmem>>, %arg3: memref<1x256xf32, #tpu.memory_space<vmem>>, %arg4: memref<2x256xf32, #tpu.memory_space<vmem>>) attributes {dimension_semantics = [#tpu.dimension_semantics<parallel>, #tpu.dimension_semantics<parallel>], iteration_bounds = array<i64: 1, 1>, scalar_prefetch = 0 : i64, scratch_operands = 0 : i64, tpu.core_type = #tpu.core_type<tc>, window_params = [{transform_indices = @transform_0, window_bounds = array<i64: 2, 256>}, {transform_indices = @transform_1, window_bounds = array<i64: 1, 256>}, {transform_indices = @transform_2, window_bounds = array<i64: 2, 256>}]} {
    %c0 = arith.constant 0 : index
    %c0_0 = arith.constant 0 : index
    %0 = vector.load %arg2[%c0, %c0_0] : memref<2x256xf32, #tpu.memory_space<vmem>>, vector<2x256xf32>
    %c0_1 = arith.constant 0 : index
    %c0_2 = arith.constant 0 : index
    %1 = vector.load %arg3[%c0_1, %c0_2] : memref<1x256xf32, #tpu.memory_space<vmem>>, vector<1x256xf32>
    %2 = vector.broadcast %1 : vector<1x256xf32> to vector<2x256xf32>
    %3 = arith.addf %0, %2 : vector<2x256xf32>
    %c0_3 = arith.constant 0 : index
    %c0_4 = arith.constant 0 : index
    %4 = vector.load %arg4[%c0_3, %c0_4] : memref<2x256xf32, #tpu.memory_space<vmem>>, vector<2x256xf32>
    tpu.vector_store %arg4[%c0_3, %c0_4], %3 {strides = array<i32>} : memref<2x256xf32, #tpu.memory_space<vmem>>, vector<2x256xf32>,
    return
  }
  func.func @transform_0(%arg0: i32, %arg1: i32) -> (i32, i32) {
    %c0_i32 = arith.constant 0 : i32
    return %arg1, %arg0 : i32, i32
  }
  func.func @transform_1(%arg0: i32, %arg1: i32) -> (i32, i32) {
    %c0_i32 = arith.constant 0 : i32
    %c0_i32_0 = arith.constant 0 : i32
    return %c0_i32, %arg0 : i32, i32
  }
  func.func @transform_2(%arg0: i32, %arg1: i32) -> (i32, i32) {
    %c0_i32 = arith.constant 0 : i32
    return %arg1, %arg0 : i32, i32
  }
}

</mosaic_0001>

<bundles_post_ra>
// kernel: tpu_custom_call.1
= control target key start
LH: loop header
LB: loop body
LE: loop exit
PB: predicated region body
PF: predicated region fallthrough
CT: control target
= control target key end

     0   :  { %7 = vsyncpa [#allocation3], 0  ;;  %s157_s0 = inlined_call_operand.hbm [shape: f32[2,256], index: 0, kind: input, shape index: {}]   ;;  %s158_s1 = inlined_call_operand.vmem [shape: f32[1,256], index: 1, kind: input, shape index: {}]   ;;  %s159_s2 = inlined_call_operand.hbm [shape: f32[2,256], index: 2, kind: output, shape index: {}]  }
   0x1   :  { %8 = vsyncpa [#allocation4], 0  ;;  %s112_s9 = smov [#allocation2]   ;;  %s64_s13 = scalar_lea.hbm %s157_s0, 64 }
   0x2   :  { %s15_s10 = sshll.u32 %s112_s9, 4  ;;  %p65_p0 = scmp.ne.s32.totalorder %s157_s0, %s64_s13  ;;  %s16_s10 = int_to_ptr.vmem [resolvable:$true] %s15_s10 }
   0x3   :  { %p68_p1 = scmp.lt.u32.totalorder %s64_s13, %s157_s0 }
   0x5   :  { %p70_p2 = pnand %p68_p1, %p65_p0 }
   0x7   :  { %73 = shalt.err (!%p70_p2)
}
   0x8   :  { %s74_s18 = scalar_lea.vmem %s16_s10, 64  ;;  %p79_p4 = scmp.lt.s32.totalorder %s16_s10, %s16_s10 }
   0x9   :  { %p75_p3 = scmp.ne.s32.totalorder %s16_s10, %s74_s18  ;;  %p80_p5 = scmp.lt.s32.totalorder %s74_s18, %s74_s18 }
   0xb   :  { %p81_p6 = por %p80_p5, %p79_p4 }
   0xd   :  { %p82_p7 = pnand %p81_p6, %p75_p3 }
   0xf   :  { %85 = shalt.err (!%p82_p7)
}
  0x10   :  { %18 = dma.hbm_to_vmem [thread:$0]  %s157_s0, 64, %s16_s10, [#allocation3]  }
  0x11   :  { %108 = dma.done.wait [#allocation3], 64  }
  0x12   :  { %109 = vsyncadd [#allocation3], 4294967232  ;;  %v27_v0 = vlaneseq  ;;  %v113_v1 = vmov 1983009808   ;;  %v25_v7 = vld [vmem:[%s158_s1] sm:$0x3] }
  0x13   :  { %v37_v2 = vunpack.c.l.s4 %v113_v1  ;;  %v24_v12 = vld [vmem:[#allocation2] sm:$0xf]  ;;  %s114_s23 = smov [#allocation5]  }
  0x14   :  { %v28_v3 = vshrl.u32 %v27_v0, 7  ;;  %s52_s0 = sshll.u32 %s114_s23, 4  ;;  %s53_s0 = int_to_ptr.vmem [resolvable:$true] %s52_s0 }
  0x15   :  { %v38_v6 = vunpack.c.0.s8 %v37_v2  ;;  %s86_s24 = scalar_lea.vmem %s53_s0, 64  ;;  %p91_p9 = scmp.lt.s32.totalorder %s53_s0, %s53_s0 }
  0x16   :  { %v29_v4 = vsub.s32 0, %v28_v3  ;;  %v33_v5 = vsub.s32 1, %v28_v3  ;;  %p87_p8 = scmp.ne.s32.totalorder %s53_s0, %s86_s24  ;;  %p92_p10 = scmp.lt.s32.totalorder %s86_s24, %s86_s24 }
  0x17   :  { %v41_v10 = vsub.s32 %v38_v6, %v28_v3 }
  0x18   :  { %v30_v8 = vrot.slane %v25_v7, %v29_v4  ;;  %v34_v9 = vrot.slane %v25_v7, %v33_v5  ;;  %p93_p11 = por %p92_p10, %p91_p9 }
  0x1a   :  { %v35_v11 = vcombine.low %v30_v8, %v34_v9  ;;  %p94_p12 = pnand %p93_p11, %p87_p8 }
  0x1c   :  { %v42_v13 = vrot.slane %v35_v11, %v41_v10 }
  0x1e   :  { %v44_v14 = vadd.f32 %v42_v13, %v24_v12 }
  0x20   :  { %45 = vst [vmem:[#allocation5] sm:$0xf] %v44_v14 }
  0x21   :  { %97 = shalt.err (!%p94_p12)
}
  0x22   :  { %s98_s26 = scalar_lea.hbm %s159_s2, 64 }
  0x23   :  { %p99_p13 = scmp.ne.s32.totalorder %s159_s2, %s98_s26  ;;  %p102_p0 = scmp.lt.u32.totalorder %s98_s26, %s159_s2 }
  0x25   :  { %p104_p1 = pnand %p102_p0, %p99_p13 }
  0x27   :  { %107 = shalt.err (!%p104_p1)
}
  0x28   :  { %55 = dma.vmem_to_hbm [thread:$0]  %s53_s0, 64, %s159_s2, [#allocation4]  }
  0x29   :  { %110 = dma.done.wait [#allocation4], 64  }
  0x2a   :  { %111 = vsyncadd [#allocation4], 4294967232 }
  0x2b   :  { %59 = vsyncpa [#allocation3], 1 }
  0x2c   :  { %60 = vsyncpa [#allocation4], 1 }

</bundles_post_ra>
